<compile_context>
chip_gen: v7x
topology: tpu7x:2x2x1
jax: 0.10.0
libtpu: 0.0.40
codegen_flags: <defaults>
</compile_context>

<pallas_src>
import jax
import jax.numpy as jnp
from jax.experimental import pallas as pl
from jax.experimental.pallas import tpu as pltpu


def _round_up(x, m):
    return (x + m - 1) // m * m


def _make_sensor_kernel(n_ch, clip_lo, clip_hi, with_noise):
    def kernel(*refs):
        if with_noise:
            re_ref, im_ref, eps_ref, o_ref = refs
        else:
            re_ref, im_ref, o_ref = refs

        # Per-channel accumulation on (r_tile, lanes) slabs.  The channel axis
        # is a major dim, so this is a pure VPU fma chain with one
        # output-sized f32 accumulator live (no cross-lane/XLU work).
        acc = None
        for c in range(n_ch):
            rc = re_ref[0, c, :, :]
            ic = im_ref[0, c, :, :]
            sq = rc * rc + ic * ic
            acc = sq if acc is None else acc + sq

        if with_noise:
            eps = eps_ref[0, :, :]
            acc = jnp.maximum(acc + jnp.sqrt(acc) * eps, 0.0)

        o_ref[0, :, :] = jnp.clip(acc, clip_lo, clip_hi)

    return kernel


def sensor_pallas(field_re, field_im, eps=None, *,
                  shot_noise_modes=("approximated_poisson",),
                  clip=(1e-20, 1.0)):
    """field_re/field_im: [B, C, H, W] float32; eps: [B, H, W] float32 or None.

    Returns channel-summed sensor intensity [B, H, W] float32.
    """
    B, C, H, W = field_re.shape
    HW = H * W

    # Mirror the reference: a bare string becomes a list of characters, so it
    # never matches any named mode.
    modes = tuple(shot_noise_modes)
    with_noise = "approximated_poisson" in modes

    # ---- layout: present a lane-dense (rows, lanes) plane, no padding copies ----
    if W % 128 == 0:
        rows, lanes = H, W
        re4, im4 = field_re, field_im
        eps3 = eps
    elif HW % 128 == 0:
        # Free row-major reshape (no data movement) to a 128-lane layout.
        rows, lanes = HW // 128, 128
        re4 = field_re.reshape(B, C, rows, lanes)
        im4 = field_im.reshape(B, C, rows, lanes)
        eps3 = None if eps is None else eps.reshape(B, rows, lanes)
    else:
        # Ragged lane dim: blocks span the full W (masked lane stores).
        rows, lanes = H, W
        re4, im4 = field_re, field_im
        eps3 = eps

    # ---- tile sizing with (8,128)-padding-aware VMEM accounting ----
    try:
        vmem_cap = int(pltpu.get_tpu_info().vmem_capacity_bytes)
    except Exception:
        vmem_cap = 64 << 20  # assume the smallest-VMEM generation (v7x)
    small_vmem = vmem_cap <= (64 << 20)
    per_buffer_target = (8 << 20) if small_vmem else (16 << 20)

    n_planes = 2 * C + (2 if with_noise else 1)       # re,im (C each) + eps? + out
    lane_pad = max(_round_up(lanes, 128), 128)
    bytes_per_row = n_planes * lane_pad * 4           # per pipeline buffer, f32

    r_max = max((per_buffer_target // bytes_per_row) // 8 * 8, 8)
    r_tile = rows if rows <= r_max else r_max         # full-dim or multiple of 8

    # v7x: keep >= 2 grid steps when B == 1 so both TensorCores get work.
    if B == 1 and rows > 8 and pl.cdiv(rows, r_tile) < 2:
        half = _round_up((rows + 1) // 2, 8)
        if half < rows:
            r_tile = min(r_tile, half)

    n_row_tiles = pl.cdiv(rows, r_tile)

    tile_bytes = n_planes * _round_up(r_tile, 8) * lane_pad * 4
    vmem_hard_cap = (44 << 20) if small_vmem else (96 << 20)
    vmem_limit = int(min(max(2 * tile_bytes + (8 << 20), 16 << 20), vmem_hard_cap))

    in_arrays = [re4, im4]
    in_specs = [
        pl.BlockSpec((1, C, r_tile, lanes), lambda b, t: (b, 0, t, 0)),
        pl.BlockSpec((1, C, r_tile, lanes), lambda b, t: (b, 0, t, 0)),
    ]
    if with_noise:
        assert eps3 is not None, "eps required for approximated_poisson"
        in_arrays.append(eps3)
        in_specs.append(pl.BlockSpec((1, r_tile, lanes), lambda b, t: (b, t, 0)))

    kernel = _make_sensor_kernel(C, float(clip[0]), float(clip[1]), with_noise)

    out = pl.pallas_call(
        kernel,
        out_shape=jax.ShapeDtypeStruct((B, rows, lanes), jnp.float32),
        grid_spec=pltpu.PrefetchScalarGridSpec(
            num_scalar_prefetch=0,
            grid=(B, n_row_tiles),
            in_specs=in_specs,
            out_specs=pl.BlockSpec((1, r_tile, lanes), lambda b, t: (b, t, 0)),
        ),
        compiler_params=pltpu.CompilerParams(
            dimension_semantics=("parallel", "parallel"),
            vmem_limit_bytes=vmem_limit,
        ),
    )(*in_arrays)

    return out.reshape(B, H, W)


def sensor_reference(field_re, field_im, eps, *, clip=(1e-20, 1.0)):
    intensity = jnp.sum(field_re ** 2 + field_im ** 2, axis=1)
    approx = intensity + jnp.sqrt(intensity) * eps
    intensity = jnp.maximum(approx, 0.0)
    return jnp.clip(intensity, clip[0], clip[1])


if __name__ == "__main__":
    key = jax.random.PRNGKey(0)

    # Case 1: small square plane (H*W % 128 == 0), approximated-Poisson noise.
    B, C, H, W = 2, 4, 16, 16
    k_re, k_im, k_eps, k2 = jax.random.split(key, 4)
    field_re = jax.random.normal(k_re, (B, C, H, W), dtype=jnp.float32) * 0.3
    field_im = jax.random.normal(k_im, (B, C, H, W), dtype=jnp.float32) * 0.3
    # deterministic draw standing in for torch.randn_like(intensity)
    eps = jax.random.normal(k_eps, (B, H, W), dtype=jnp.float32)

    out = jax.block_until_ready(
        sensor_pallas(field_re, field_im, eps,
                      shot_noise_modes=("approximated_poisson",),
                      clip=(1e-20, 1.0)))
    ref = sensor_reference(field_re, field_im, eps, clip=(1e-20, 1.0))
    assert out.shape == (B, H, W), out.shape
    assert out.dtype == jnp.float32, out.dtype
    assert jnp.allclose(out, ref, atol=1e-5, rtol=1e-5), "mismatch vs reference"

    # Case 2: no-noise path (eps never declared / DMA'd).
    out_nn = jax.block_until_ready(
        sensor_pallas(field_re, field_im, None, shot_noise_modes=(),
                      clip=(1e-20, 1.0)))
    ref_nn = jnp.clip(jnp.sum(field_re ** 2 + field_im ** 2, axis=1),
                      1e-20, 1.0)
    assert jnp.allclose(out_nn, ref_nn, atol=1e-5, rtol=1e-5), "no-noise mismatch"

    # Case 3: lane-aligned W (W % 128 == 0) with B=1 — exercises native row
    # tiling and the >=2-tile split that keeps v7x's second core busy.
    B2, C2, H2, W2 = 1, 2, 16, 128
    kr, ki, ke = jax.random.split(k2, 3)
    fr2 = jax.random.normal(kr, (B2, C2, H2, W2), dtype=jnp.float32) * 0.2
    fi2 = jax.random.normal(ki, (B2, C2, H2, W2), dtype=jnp.float32) * 0.2
    ep2 = jax.random.normal(ke, (B2, H2, W2), dtype=jnp.float32)
    out2 = jax.block_until_ready(
        sensor_pallas(fr2, fi2, ep2,
                      shot_noise_modes=("approximated_poisson",),
                      clip=(1e-20, 1.0)))
    ref2 = sensor_reference(fr2, fi2, ep2, clip=(1e-20, 1.0))
    assert out2.shape == (B2, H2, W2), out2.shape
    assert jnp.allclose(out2, ref2, atol=1e-5, rtol=1e-5), "tiled-path mismatch"

    print("KERNEL_OK")
</pallas_src>

<mosaic_0001>
module attributes {stable_mosaic.version = 11 : i64} {
  func.func @kernel(%arg0: i32, %arg1: i32, %arg2: memref<1x4x2x128xf32, #tpu.memory_space<vmem>>, %arg3: memref<1x4x2x128xf32, #tpu.memory_space<vmem>>, %arg4: memref<1x2x128xf32, #tpu.memory_space<vmem>>, %arg5: memref<1x2x128xf32, #tpu.memory_space<vmem>>) attributes {dimension_semantics = [#tpu.dimension_semantics<parallel>, #tpu.dimension_semantics<parallel>], iteration_bounds = array<i64: 2, 1>, scalar_prefetch = 0 : i64, scratch_operands = 0 : i64, tpu.core_type = #tpu.core_type<tc>, window_params = [{transform_indices = @transform_0, window_bounds = array<i64: 1, 4, 2, 128>}, {transform_indices = @transform_1, window_bounds = array<i64: 1, 4, 2, 128>}, {transform_indices = @transform_2, window_bounds = array<i64: 1, 2, 128>}, {transform_indices = @transform_3, window_bounds = array<i64: 1, 2, 128>}]} {
    %c0 = arith.constant 0 : index
    %c0_0 = arith.constant 0 : index
    %c0_1 = arith.constant 0 : index
    %c0_2 = arith.constant 0 : index
    %0 = vector.load %arg2[%c0, %c0_0, %c0_1, %c0_2] : memref<1x4x2x128xf32, #tpu.memory_space<vmem>>, vector<1x1x2x128xf32>
    %1 = vector.shape_cast %0 : vector<1x1x2x128xf32> to vector<2x128xf32>
    %c0_3 = arith.constant 0 : index
    %c0_4 = arith.constant 0 : index
    %c0_5 = arith.constant 0 : index
    %c0_6 = arith.constant 0 : index
    %2 = vector.load %arg3[%c0_3, %c0_4, %c0_5, %c0_6] : memref<1x4x2x128xf32, #tpu.memory_space<vmem>>, vector<1x1x2x128xf32>
    %3 = vector.shape_cast %2 : vector<1x1x2x128xf32> to vector<2x128xf32>
    %4 = arith.mulf %1, %1 : vector<2x128xf32>
    %5 = arith.mulf %3, %3 : vector<2x128xf32>
    %6 = arith.addf %4, %5 : vector<2x128xf32>
    %c0_7 = arith.constant 0 : index
    %c1 = arith.constant 1 : index
    %c0_8 = arith.constant 0 : index
    %c0_9 = arith.constant 0 : index
    %7 = vector.load %arg2[%c0_7, %c1, %c0_8, %c0_9] : memref<1x4x2x128xf32, #tpu.memory_space<vmem>>, vector<1x1x2x128xf32>
    %8 = vector.shape_cast %7 : vector<1x1x2x128xf32> to vector<2x128xf32>
    %c0_10 = arith.constant 0 : index
    %c1_11 = arith.constant 1 : index
    %c0_12 = arith.constant 0 : index
    %c0_13 = arith.constant 0 : index
    %9 = vector.load %arg3[%c0_10, %c1_11, %c0_12, %c0_13] : memref<1x4x2x128xf32, #tpu.memory_space<vmem>>, vector<1x1x2x128xf32>
    %10 = vector.shape_cast %9 : vector<1x1x2x128xf32> to vector<2x128xf32>
    %11 = arith.mulf %8, %8 : vector<2x128xf32>
    %12 = arith.mulf %10, %10 : vector<2x128xf32>
    %13 = arith.addf %11, %12 : vector<2x128xf32>
    %14 = arith.addf %6, %13 : vector<2x128xf32>
    %c0_14 = arith.constant 0 : index
    %c2 = arith.constant 2 : index
    %c0_15 = arith.constant 0 : index
    %c0_16 = arith.constant 0 : index
    %15 = vector.load %arg2[%c0_14, %c2, %c0_15, %c0_16] : memref<1x4x2x128xf32, #tpu.memory_space<vmem>>, vector<1x1x2x128xf32>
    %16 = vector.shape_cast %15 : vector<1x1x2x128xf32> to vector<2x128xf32>
    %c0_17 = arith.constant 0 : index
    %c2_18 = arith.constant 2 : index
    %c0_19 = arith.constant 0 : index
    %c0_20 = arith.constant 0 : index
    %17 = vector.load %arg3[%c0_17, %c2_18, %c0_19, %c0_20] : memref<1x4x2x128xf32, #tpu.memory_space<vmem>>, vector<1x1x2x128xf32>
    %18 = vector.shape_cast %17 : vector<1x1x2x128xf32> to vector<2x128xf32>
    %19 = arith.mulf %16, %16 : vector<2x128xf32>
    %20 = arith.mulf %18, %18 : vector<2x128xf32>
    %21 = arith.addf %19, %20 : vector<2x128xf32>
    %22 = arith.addf %14, %21 : vector<2x128xf32>
    %c0_21 = arith.constant 0 : index
    %c3 = arith.constant 3 : index
    %c0_22 = arith.constant 0 : index
    %c0_23 = arith.constant 0 : index
    %23 = vector.load %arg2[%c0_21, %c3, %c0_22, %c0_23] : memref<1x4x2x128xf32, #tpu.memory_space<vmem>>, vector<1x1x2x128xf32>
    %24 = vector.shape_cast %23 : vector<1x1x2x128xf32> to vector<2x128xf32>
    %c0_24 = arith.constant 0 : index
    %c3_25 = arith.constant 3 : index
    %c0_26 = arith.constant 0 : index
    %c0_27 = arith.constant 0 : index
    %25 = vector.load %arg3[%c0_24, %c3_25, %c0_26, %c0_27] : memref<1x4x2x128xf32, #tpu.memory_space<vmem>>, vector<1x1x2x128xf32>
    %26 = vector.shape_cast %25 : vector<1x1x2x128xf32> to vector<2x128xf32>
    %27 = arith.mulf %24, %24 : vector<2x128xf32>
    %28 = arith.mulf %26, %26 : vector<2x128xf32>
    %29 = arith.addf %27, %28 : vector<2x128xf32>
    %30 = arith.addf %22, %29 : vector<2x128xf32>
    %c0_28 = arith.constant 0 : index
    %c0_29 = arith.constant 0 : index
    %c0_30 = arith.constant 0 : index
    %31 = vector.load %arg4[%c0_28, %c0_29, %c0_30] : memref<1x2x128xf32, #tpu.memory_space<vmem>>, vector<1x2x128xf32>
    %32 = vector.shape_cast %31 : vector<1x2x128xf32> to vector<2x128xf32>
    %33 = math.sqrt %30 : vector<2x128xf32>
    %34 = arith.mulf %33, %32 : vector<2x128xf32>
    %35 = arith.addf %30, %34 : vector<2x128xf32>
    %cst = arith.constant 0.000000e+00 : f32
    %36 = vector.broadcast %cst : f32 to vector<2x128xf32>
    %37 = arith.maximumf %35, %36 : vector<2x128xf32>
    %cst_31 = arith.constant 9.99999968E-21 : f32
    %cst_32 = arith.constant 1.000000e+00 : f32
    %38 = vector.broadcast %cst_31 : f32 to vector<2x128xf32>
    %39 = arith.maximumf %38, %37 : vector<2x128xf32>
    %40 = vector.broadcast %cst_32 : f32 to vector<2x128xf32>
    %41 = arith.minimumf %40, %39 : vector<2x128xf32>
    %c0_33 = arith.constant 0 : index
    %c0_34 = arith.constant 0 : index
    %c0_35 = arith.constant 0 : index
    %42 = vector.load %arg5[%c0_33, %c0_34, %c0_35] : memref<1x2x128xf32, #tpu.memory_space<vmem>>, vector<1x2x128xf32>
    %43 = vector.shape_cast %42 : vector<1x2x128xf32> to vector<2x128xf32>
    %44 = vector.shape_cast %41 : vector<2x128xf32> to vector<1x2x128xf32>
    tpu.vector_store %arg5[%c0_33, %c0_34, %c0_35], %44 {strides = array<i32>} : memref<1x2x128xf32, #tpu.memory_space<vmem>>, vector<1x2x128xf32>,
    return
  }
  func.func @transform_0(%arg0: i32, %arg1: i32) -> (i32, i32, i32, i32) {
    %c0_i32 = arith.constant 0 : i32
    %c0_i32_0 = arith.constant 0 : i32
    %c0_i32_1 = arith.constant 0 : i32
    return %arg0, %c0_i32, %arg1, %c0_i32_0 : i32, i32, i32, i32
  }
  func.func @transform_1(%arg0: i32, %arg1: i32) -> (i32, i32, i32, i32) {
    %c0_i32 = arith.constant 0 : i32
    %c0_i32_0 = arith.constant 0 : i32
    %c0_i32_1 = arith.constant 0 : i32
    return %arg0, %c0_i32, %arg1, %c0_i32_0 : i32, i32, i32, i32
  }
  func.func @transform_2(%arg0: i32, %arg1: i32) -> (i32, i32, i32) {
    %c0_i32 = arith.constant 0 : i32
    %c0_i32_0 = arith.constant 0 : i32
    return %arg0, %arg1, %c0_i32 : i32, i32, i32
  }
  func.func @transform_3(%arg0: i32, %arg1: i32) -> (i32, i32, i32) {
    %c0_i32 = arith.constant 0 : i32
    %c0_i32_0 = arith.constant 0 : i32
    return %arg0, %arg1, %c0_i32 : i32, i32, i32
  }
}

</mosaic_0001>

<bundles_post_ra>
// kernel: tpu_custom_call.1
= control target key start
LH: loop header
LB: loop body
LE: loop exit
PB: predicated region body
PF: predicated region fallthrough
CT: control target
= control target key end

     0   :  { %8 = vsyncpa [#allocation3], 0  ;;  %s967_s0 = inlined_call_operand.hbm [shape: f32[2,4,2,128], index: 0, kind: input, shape index: {}]   ;;  %s968_s1 = inlined_call_operand.hbm [shape: f32[2,4,2,128], index: 1, kind: input, shape index: {}]   ;;  %s969_s2 = inlined_call_operand.vmem [shape: f32[2,2,128], index: 2, kind: input, shape index: {}]   ;;  %s970_s3 = inlined_call_operand.hbm [shape: f32[2,2,128], index: 3, kind: output, shape index: {}]  }
   0x1   :  { %10 = vsyncpa [#allocation3 + $0x1], 0 }
   0x2   :  { %11 = vsyncpa [#allocation6], 0 }
   0x3   :  { %13 = vsyncpa [#allocation6 + $0x1], 0 }
   0x4   :  { %14 = vsyncpa [#allocation4], 0 }
   0x5   :  { %16 = vsyncpa [#allocation4 + $0x1], 0  ;;  %s727_s12 = smov 0   ;;  %s729_s13 = smov 0  }
   0x6   :  { %s731_s14 = smov 0   ;;  %s733_s15 = smov 0  }
   0x7   :  { %s735_s16 = smov 0   ;;  %s737_s17 = smov 0  }
   0x8 LB: > { %s456_s18 = sadd.s32 4294967295, %s700_s17   ;;  %s457_s19 = sadd.s32 4294967294, %s700_s17   ;;  %s700_s17 = sphi %s737_s17, %s22_s17   ;;  %s696_s16 = sphi %s735_s16, %s988_s16   ;;  %s692_s15 = sphi %s733_s15, %s987_s15   ;;  %s688_s14 = sphi %s731_s14, %s986_s14   ;;  %s684_s13 = sphi %s729_s13, %s985_s13   ;;  %s680_s12 = sphi %s727_s12, %s984_s12  }
   0x9   : > { %s34_s20 = sadd.s32 1, %s696_s16  ;;  %s43_s21 = sadd.s32 1, %s688_s14 }
   0xa   : > { %p36_p0 = scmp.ge.s32.totalorder %s34_s20, 2  ;;  %p50_p1 = scmp.ne.s32.totalorder %s688_s14, %s684_s13 }
   0xb   : > { %p51_p2 = scmp.eq.s32.totalorder %s700_s17, 0  ;;  %p56_p3 = scmp.ne.s32.totalorder %s684_s13, %s680_s12 }
   0xc   : > { %s990_s20 = smov (%p36_p0, %s34_s20), 0  ;;  %p57_p5 = scmp.eq.s32.totalorder %s456_s18, 0 }
   0xd   : > { %p768_p4 = por %p51_p2, %p50_p1  ;;  %s38_s23 = ssub.s32 %s696_s16, %s990_s20 }
   0xe   : > { %p138_p6 = scmp.eq.s32.totalorder %s456_s18, 1  ;;  %p41_p7 = scmp.eq.s32.totalorder %s38_s23, 0 }
   0xf   : > { %p774_p8 = por %p57_p5, %p56_p3  ;;  %p144_p10 = scmp.eq.s32.totalorder %s457_s19, 1 }
  0x10   : > { %p778_p9 = por %p138_p6, %p50_p1  ;;  %p500_p13 = scmp.lt.s32.totalorder %s700_s17, 2 }
  0x11   : > { %s974_s24 = scalar_select %p774_p8, 1, 0 }
  0x12   : > { %s975_s25 = scalar_select %p778_p9, 1, 0 }
  0x13   : > { %s783_s26 = scalar_select %p41_p7, %s688_s14, %s43_s21  }
  0x14   : > { %p785_p11 = por %p144_p10, %p56_p3  ;;  %s792_s28 = sand.u32 1, %s688_s14  }
  0x15   : > { %s460_s29 = sshll.u32 %s792_s28, 3  ;;  %s481_s30 = sshll.u32 %s696_s16, 7 }
  0x16   : > { %s976_s27 = scalar_select %p785_p11, 1, 0 }
  0x17   : > { %s801_s6 = scalar_lea.hbm %s967_s0, %s481_s30  ;;  %s168_s7 = scalar_lea.vmem [#allocation2], %s460_s29 }
  0x18   : > { %s176_s8 = sshll.u32 %s168_s7, 4  ;;  %p809_p0 = pnand %p500_p13, %p768_p4  ;;  %s805_s8 = int_to_ptr.vmem [resolvable:$true] %s176_s8 }
  0x19   : > { %s165_s10 = scalar_lea.sflag [#allocation3], %s792_s28  ;;  %s554_s11 = scalar_lea.hbm %s801_s6, 128 }
  0x1a   : > { %p555_p2 = scmp.ne.s32.totalorder %s801_s6, %s554_s11  ;;  %p556_p3 = pneg %p809_p0 }
  0x1b   : > { %s559_s21 = scalar_lea.hbm %s967_s0, 256  ;;  %p560_p4 = scmp.lt.u32.totalorder %s801_s6, %s967_s0 }
  0x1c   : > { %p557_p5 = pnand %p556_p3, %p555_p2  ;;  %p561_p7 = scmp.lt.u32.totalorder %s559_s21, %s554_s11 }
  0x1d   : > { %p563_p13 = scmp.lt.u32.totalorder %s554_s11, %s801_s6 }
  0x1e   : > { %p558_p6 = pneg %p557_p5  ;;  %p562_p10 = por %p561_p7, %p560_p4 }
  0x20   : > { %p564_p12 = por %p563_p13, %p562_p10 }
  0x22   : > { %p565_p1 = pnand %p564_p12, %p558_p6 }
  0x24   : > { %568 = shalt.err (!%p565_p1)
}
  0x25   : > { %s569_s4 = scalar_lea.vmem %s805_s8, 128  ;;  %s702_s5 = smov [#allocation2]  }
  0x26   : > { %p570_p2 = scmp.ne.s32.totalorder %s805_s8, %s569_s4  ;;  %s574_s7 = sshll.u32 %s702_s5, 4  ;;  %s575_s7 = int_to_ptr.vmem [resolvable:$false] %s574_s7 }
  0x27   : > { %s576_s18 = scalar_lea.vmem %s575_s7, 256  ;;  %p577_p9 = scmp.lt.s32.totalorder %s805_s8, %s575_s7 }
  0x28   : > { %p572_p5 = pnand %p570_p2, %p556_p3  ;;  %p578_p4 = scmp.lt.s32.totalorder %s576_s18, %s569_s4 }
  0x2a   : > { %p573_p11 = pneg %p572_p5  ;;  %p579_p7 = por %p578_p4, %p577_p9 }
  0x2c   : > { %p580_p10 = pnand %p579_p7, %p573_p11 }
  0x2e   : > { %583 = shalt.err (!%p580_p10)
}
  0x2f   : > { %s703_s11 = smov 32   ;;  %s704_s19 = smov 2  }
  0x30   : > { %492 = dma.hbm_to_vmem [thread:$0]  (!%p809_p0), %s801_s6, 128, %s805_s8, %s165_s10, %s703_s11, %s703_s11, %s704_s19  }
  0x31   : > { %p216_p9 = scmp.lt.s32.totalorder %s700_s17, 3  ;;  %s851_s23 = scalar_lea.hbm %s968_s1, %s481_s30 }
  0x32   : > { %p978_p11 = scmp.ge.s32.totalorder %s700_s17, 1  ;;  %s190_s5 = scalar_lea.vmem [#allocation5], %s460_s29 }
  0x33   : > { %s198_s7 = sshll.u32 %s190_s5, 4  ;;  %s187_s6 = scalar_lea.sflag [#allocation6], %s792_s28  ;;  %s861_s7 = int_to_ptr.vmem [resolvable:$true] %s198_s7 }
  0x34   : > { %p855_p12 = pnand %p978_p11, %p216_p9  ;;  %s584_s8 = scalar_lea.hbm %s851_s23, 128 }
  0x35   : > { %p585_p1 = scmp.ne.s32.totalorder %s851_s23, %s584_s8  ;;  %s589_s18 = scalar_lea.hbm %s968_s1, 256 }
  0x36   : > { %p590_p2 = scmp.lt.u32.totalorder %s851_s23, %s968_s1  ;;  %p591_p5 = scmp.lt.u32.totalorder %s589_s18, %s584_s8 }
  0x37   : > { %p587_p6 = pnand %p585_p1, %p556_p3  ;;  %p593_p7 = scmp.lt.u32.totalorder %s584_s8, %s851_s23 }
  0x38   : > { %p592_p4 = por %p591_p5, %p590_p2 }
  0x39   : > { %p588_p13 = pneg %p587_p6 }
  0x3a   : > { %p594_p10 = por %p593_p7, %p592_p4 }
  0x3c   : > { %p595_p9 = pnand %p594_p10, %p588_p13 }
  0x3e   : > { %598 = shalt.err (!%p595_p9)
}
  0x3f   : > { %s599_s29 = scalar_lea.vmem %s861_s7, 128  ;;  %s705_s5 = smov [#allocation5]  }
  0x40   : > { %p600_p11 = scmp.ne.s32.totalorder %s861_s7, %s599_s29  ;;  %s604_s30 = sshll.u32 %s705_s5, 4  ;;  %s605_s30 = int_to_ptr.vmem [resolvable:$false] %s604_s30 }
  0x41   : > { %s606_s10 = scalar_lea.vmem %s605_s30, 256  ;;  %p607_p8 = scmp.lt.s32.totalorder %s861_s7, %s605_s30 }
  0x42   : > { %p602_p1 = pnand %p600_p11, %p556_p3  ;;  %p608_p2 = scmp.lt.s32.totalorder %s606_s10, %s599_s29 }
  0x44   : > { %p603_p6 = pneg %p602_p1  ;;  %p609_p5 = por %p608_p2, %p607_p8 }
  0x46   : > { %p610_p4 = pnand %p609_p5, %p603_p6 }
  0x48   : > { %613 = shalt.err (!%p610_p4)
}
  0x49   : > { %495 = dma.hbm_to_vmem [thread:$0]  (!%p809_p0), %s851_s23, 128, %s861_s7, %s187_s6, %s703_s11, %s703_s11, %s704_s19  }
  0x4a   : > { %220 = sbr.rel (%p855_p12) target bundleno = 135 (0x87), region = 32  ;;  %s895_s8 = sand.u32 (!%p855_p12), 1, %s684_s13  }
  0x4b   : > { %s467_s18 = sshll.u32 (!%p855_p12), %s895_s8, 3  ;;  %s223_s21 = scalar_lea.sflag (!%p855_p12), [#allocation3], %s895_s8 }
  0x4c   : > { %s226_s9 = scalar_lea.vmem (!%p855_p12), [#allocation2], %s467_s18  ;;  %p980_p8 = scmp.ne.s32.totalorder (!%p855_p12), %s974_s24, 0 }
  0x51   : > { %667 = dma.done.wait (%p980_p8), %s223_s21, 128  }
  0x52   : > { %669 = vsyncadd (%p980_p8), %s223_s21, 4294967168  ;;  %s232_s28 = scalar_lea.sflag [#allocation6], %s895_s8  ;;  %s235_s11 = scalar_lea.vmem [#allocation5], %s467_s18 }
  0x53   : > { %671 = dma.done.wait (%p980_p8), %s232_s28, 128  }
  0x54   : > { %673 = vsyncadd (%p980_p8), %s232_s28, 4294967168  ;;  %v277_v0 = vld [vmem:[%s226_s9] sm:$0x3]  ;;  %v278_v1 = vld [vmem:[%s235_s11] sm:$0x3]  ;;  %p270_p0 = scmp.lt.s32.totalorder %s692_s15, 1 }
  0x55   : > { %v471_v2 = vld [vmem:[%s226_s9 + $0x2] sm:$0x3]  ;;  %v279_v3 = vmul.f32 %v277_v0, %v277_v0  ;;  %v280_v4 = vmul.f32 %v278_v1, %v278_v1  ;;  %v472_v5 = vld [vmem:[%s235_s11 + $0x2] sm:$0x3]  ;;  %v473_v7 = vld [vmem:[%s226_s9 + $0x4] sm:$0x3] }
  0x56   : > { %v286_v6 = vmul.f32 %v471_v2, %v471_v2  ;;  %v474_v8 = vld [vmem:[%s235_s11 + $0x4] sm:$0x3]  ;;  %v287_v9 = vmul.f32 %v472_v5, %v472_v5  ;;  %v294_v10 = vmul.f32 %v473_v7, %v473_v7  ;;  %v475_v12 = vld [vmem:[%s226_s9 + $0x6] sm:$0x3]  ;;  %v476_v13 = vld [vmem:[%s235_s11 + $0x6] sm:$0x3] }
  0x57   : > { %v295_v11 = vmul.f32 %v474_v8, %v474_v8  ;;  %v281_v14 = vadd.f32 %v280_v4, %v279_v3  ;;  %v302_v15 = vmul.f32 %v475_v12, %v475_v12  ;;  %v303_v16 = vmul.f32 %v476_v13, %v476_v13  ;;  %s271_s24 = scalar_select %p270_p0, %s692_s15, 1 }
  0x58   : > { %v288_v17 = vadd.f32 %v287_v9, %v286_v6  ;;  %s469_s6 = sshll.u32 %s895_s8, 1  ;;  %s478_s5 = sshll.u32 %s692_s15, 5 }
  0x59   : > { %v296_v18 = vadd.f32 %v295_v11, %v294_v10  ;;  %v304_v20 = vadd.f32 %v303_v16, %v302_v15  ;;  %s470_s19 = sshll.u32 %s271_s24, 1  ;;  %s269_s22 = scalar_lea.vmem [#allocation7], %s469_s6 }
  0x5a   : > { %v289_v19 = vadd.f32 %v288_v17, %v281_v14  ;;  %s276_s7 = scalar_lea.vmem %s969_s2, %s470_s19  ;;  %s335_s29 = sshll.u32 %s269_s22, 4  ;;  %s915_s29 = int_to_ptr.vmem [resolvable:$true] %s335_s29 }
  0x5b   : > { %v306_v26 = vld [vmem:[%s276_s7] sm:$0x3]  ;;  %s920_s18 = scalar_lea.hbm %s970_s3, %s478_s5  ;;  %s321_s21 = scalar_lea.sflag [#allocation4], %s895_s8 }
  0x5c   : > { %v297_v21 = vadd.f32 %v296_v18, %v289_v19  ;;  %s614_s9 = scalar_lea.vmem %s915_s29, 32  ;;  %p981_p12 = scmp.ne.s32.totalorder %s975_s25, 0 }
  0x5d   : > { %p615_p3 = scmp.ne.s32.totalorder %s915_s29, %s614_s9  ;;  %s706_s15 = smov [#allocation7]  }
  0x5e   : > { %v305_v22 = vadd.f32 %v304_v20, %v297_v21  ;;  %s618_s28 = sshll.u32 %s706_s15, 4  ;;  %s619_s28 = int_to_ptr.vmem [resolvable:$false] %s618_s28 }
  0x5f   : > { %p616_p13 = pnand %p615_p3, %p981_p12  ;;  %s620_s11 = scalar_lea.vmem %s619_s28, 64 }
  0x60   : > { %552 = vrsqrt.f32 %v305_v22  ;;  %vm309_vm0 = vcmp.eq.f32.partialorder %v305_v22, inf  ;;  %v312_v24 = vand.u32 2147483648, %v305_v22  ;;  %vm311_vm1 = vcmp.eq.f32.partialorder %v305_v22, 0.0  ;;  %p621_p10 = scmp.lt.s32.totalorder %s915_s29, %s619_s28  ;;  %p622_p9 = scmp.lt.s32.totalorder %s620_s11, %s614_s9 }
  0x61   : > { %p617_p7 = pneg %p616_p13 }
  0x62   : > { %p623_p11 = por %p622_p9, %p621_p10 }
  0x64   : > { %p624_p1 = pnand %p623_p11, %p617_p7 }
  0x6a   : > { %v553_v23 = vpop.eup %552 }
  0x6b   : > { %v308_v25 = vmul.f32 %v553_v23, %v305_v22 }
  0x6d   : > { %v310_v27 = vsel %vm309_vm0, %v305_v22, %v308_v25 }
  0x6e   : > { %v313_v28 = vsel %vm311_vm1, %v312_v24, %v310_v27 }
  0x6f   : > { %v314_v29 = vmul.f32 %v313_v28, %v306_v26 }
  0x71   : > { %v315_v30 = vadd.f32 %v314_v29, %v305_v22 }
  0x73   : > { %v316_v31 = vmax.f32 %v315_v30, 0.0 }
  0x75   : > { %v317_v32 = vmax.f32 %v316_v31, 1e-20 }
  0x77   : > { %v318_v33 = vmin.f32 %v317_v32, 1.0 }
  0x79   : > { %319 = vst [vmem:[%s269_s22] sm:$0x3] %v318_v33 }
  0x7a   : > { %627 = shalt.err (!%p624_p1)
}
  0x7b   : > { %s628_s8 = scalar_lea.hbm %s920_s18, 32  ;;  %s632_s23 = scalar_lea.hbm %s970_s3, 64 }
  0x7c   : > { %p629_p6 = scmp.ne.s32.totalorder %s920_s18, %s628_s8  ;;  %p633_p4 = scmp.lt.u32.totalorder %s920_s18, %s970_s3 }
  0x7d   : > { %p634_p8 = scmp.lt.u32.totalorder %s632_s23, %s628_s8  ;;  %p636_p3 = scmp.lt.u32.totalorder %s628_s8, %s920_s18 }
  0x7e   : > { %p630_p2 = pnand %p629_p6, %p981_p12 }
  0x7f   : > { %p635_p0 = por %p634_p8, %p633_p4 }
  0x80   : > { %p631_p5 = pneg %p630_p2 }
  0x81   : > { %p637_p13 = por %p636_p3, %p635_p0 }
  0x83   : > { %p638_p7 = pnand %p637_p13, %p631_p5 }
  0x85   : > { %641 = shalt.err (!%p638_p7)
}
  0x86   : > { %487 = dma.vmem_to_hbm [thread:$0]  (%p981_p12), %s915_s29, 32, %s920_s18, %s321_s21  }
  0x87 PF: > { %s347_s6 = sand.u32 1, %s680_s12   ;;  %p982_p10 = scmp.ne.s32.totalorder %s976_s27, 0 }
  0x88   : > { %p983_p9 = scmp.ge.s32.totalorder %s700_s17, 2  ;;  %s348_s22 = scalar_lea.sflag [#allocation4], %s347_s6 }
  0x8a   : > { %p497_p11 = pnand %p983_p9, %p982_p10 }
  0x8c   : > { %675 = dma.done.wait (!%p497_p11), %s348_s22, 32  }
  0x8d   : > { %677 = vsyncadd (!%p497_p11), %s348_s22, 4294967264  ;;  %s22_s17 = sadd.s32 1, %s700_s17   ;;  %s984_s12 = smov %s684_s13 }
  0x8e   : > { %p19_p1 = scmp.ge.s32.totalorder %s22_s17, 4   ;;  %s985_s13 = smov %s688_s14 }
  0x8f   : > { %s986_s14 = smov %s783_s26  ;;  %s987_s15 = smov %s696_s16 }
  0x90   : > { %s988_s16 = smov %s990_s20  ;;  %21 = sbr.rel (!%p19_p1) target bundleno = 8 (0x8), region = 99 }
  0x97   :  { %353 = vsyncpa [#allocation3], 1 }
  0x98   :  { %355 = vsyncpa [#allocation3 + $0x1], 1 }
  0x99   :  { %356 = vsyncpa [#allocation6], 1 }
  0x9a   :  { %358 = vsyncpa [#allocation6 + $0x1], 1 }
  0x9b   :  { %359 = vsyncpa [#allocation4], 1 }
  0x9c   :  { %361 = vsyncpa [#allocation4 + $0x1], 1 }

</bundles_post_ra>
